<compile_context>
chip_gen: v6e
topology: v6e:2x2x1
jax: 0.10.0
libtpu: 0.0.40
codegen_flags: <defaults>
</compile_context>

<pallas_src>
import functools

import jax
import jax.numpy as jnp
from jax.experimental import pallas as pl
from jax.experimental.pallas import tpu as pltpu


def _round_up(x, m):
    return (x + m - 1) // m * m


# --------------------- fused matmul (conv/fc) kernels -----------------------
# C = A @ B accumulated in fp32 over the K grid axis; BN scale/bias, optional
# residual add and optional ReLU fused into the epilogue; output stored only on
# the last K step (gated with pl.when) to save vector-store slots.

def _mm_bn_kernel(a_ref, b_ref, s_ref, c_ref, o_ref, acc_ref, *, relu):
    k = pl.program_id(2)

    @pl.when(k == 0)
    def _():
        acc_ref[...] = jnp.zeros_like(acc_ref)

    acc_ref[...] += jnp.dot(a_ref[...], b_ref[...],
                            preferred_element_type=jnp.float32)

    @pl.when(k == pl.num_programs(2) - 1)
    def _():
        y = acc_ref[...] * s_ref[...] + c_ref[...]
        if relu:
            y = jnp.maximum(y, 0.0)
        o_ref[...] = y.astype(o_ref.dtype)


def _mm_bn_res_kernel(a_ref, b_ref, s_ref, c_ref, r_ref, o_ref, acc_ref):
    k = pl.program_id(2)

    @pl.when(k == 0)
    def _():
        acc_ref[...] = jnp.zeros_like(acc_ref)

    acc_ref[...] += jnp.dot(a_ref[...], b_ref[...],
                            preferred_element_type=jnp.float32)

    @pl.when(k == pl.num_programs(2) - 1)
    def _():
        y = acc_ref[...] * s_ref[...] + c_ref[...] + r_ref[...]
        o_ref[...] = jnp.maximum(y, 0.0).astype(o_ref.dtype)


def _choose_k_tiling(K, max_tk=1536):
    """Pick (tk, Kp) so K is not (or only barely) zero-padded."""
    if K <= max_tk:
        Kp = _round_up(K, 8)          # single full-K step, minimal padding
        return Kp, Kp
    for tk in range(max_tk - max_tk % 128, 127, -128):
        if K % tk == 0:               # multiple-of-128 divisor of K
            return tk, K
    tk = 512
    return tk, _round_up(K, tk)


def matmul_fused(a, b, scale, bias, residual=None, relu=True):
    """y = relu_opt((a @ b) * scale + bias [+ residual]).

    a: (M, K) fp32/bf16   b: (K, N)   scale/bias: (N,) fp32
    residual: optional (M, N) fp32.  Returns (M, N) fp32."""
    M, K = a.shape
    K2, Ncols = b.shape
    assert K == K2

    # Tile sizes: wide (256) tiles when the problem is big enough (v6e/v7x 256^2
    # MXU), otherwise the smallest aligned tile so nothing is wasted.
    tm = 256 if M >= 256 else _round_up(M, 16)
    Np = _round_up(Ncols, 128)
    tn = 256 if Np % 256 == 0 else 128
    tk, Kp = _choose_k_tiling(K)
    Mp = _round_up(M, tm)

    # bf16 operands, fp32 accumulation.
    a_p = jnp.pad(a.astype(jnp.bfloat16), ((0, Mp - M), (0, Kp - K)))
    b_p = jnp.pad(b.astype(jnp.bfloat16), ((0, Kp - K), (0, Np - Ncols)))
    s_p = jnp.pad(scale.astype(jnp.float32).reshape(1, Ncols),
                  ((0, 0), (0, Np - Ncols)))
    c_p = jnp.pad(bias.astype(jnp.float32).reshape(1, Ncols),
                  ((0, 0), (0, Np - Ncols)))

    in_specs = [
        pl.BlockSpec((tm, tk), lambda i, j, k: (i, k)),
        pl.BlockSpec((tk, tn), lambda i, j, k: (k, j)),
        pl.BlockSpec((1, tn), lambda i, j, k: (0, j)),
        pl.BlockSpec((1, tn), lambda i, j, k: (0, j)),
    ]
    operands = [a_p, b_p, s_p, c_p]
    res_bytes = 0
    if residual is not None:
        r_p = jnp.pad(residual.astype(jnp.float32),
                      ((0, Mp - M), (0, Np - Ncols)))
        in_specs.append(pl.BlockSpec((tm, tn), lambda i, j, k: (i, j)))
        operands.append(r_p)
        res_bytes = Mp * Np * 4
        kernel = _mm_bn_res_kernel
    else:
        kernel = functools.partial(_mm_bn_kernel, relu=relu)

    # Explicit VMEM budget from actual tile sizes (double-buffered ins/outs + acc).
    need = (2 * (tm * tk * 2 + tk * tn * 2 + 2 * tn * 4 + tm * tn * 4
                 + (tm * tn * 4 if residual is not None else 0))
            + tm * tn * 4)
    vmem = int(min(max(4 * need, 24 * 2**20), 48 * 2**20))

    cost = pl.CostEstimate(
        flops=int(2 * Mp * Np * Kp),
        transcendentals=0,
        bytes_accessed=int(Mp * Kp * 2 + Kp * Np * 2 + Mp * Np * 4
                           + 2 * Np * 4 + res_bytes),
    )

    out = pl.pallas_call(
        kernel,
        out_shape=jax.ShapeDtypeStruct((Mp, Np), jnp.float32),
        grid_spec=pltpu.PrefetchScalarGridSpec(
            num_scalar_prefetch=0,
            grid=(Mp // tm, Np // tn, Kp // tk),
            in_specs=in_specs,
            out_specs=pl.BlockSpec((tm, tn), lambda i, j, k: (i, j)),
            scratch_shapes=[pltpu.VMEM((tm, tn), jnp.float32)]),
        compiler_params=pltpu.CompilerParams(
            dimension_semantics=("parallel", "parallel", "arbitrary"),
            vmem_limit_bytes=vmem),
        cost_estimate=cost,
    )(*operands)
    return out[:M, :Ncols]


# ----------------------------- pooling kernels ------------------------------

def _max_reduce_kernel(p_ref, o_ref):
    o_ref[...] = jnp.max(p_ref[...], axis=0)


def _avgpool_kernel(x_ref, o_ref, acc_ref, *, inv_hw):
    @pl.when(pl.program_id(0) == 0)
    def _():
        acc_ref[...] = jnp.zeros_like(acc_ref)

    acc_ref[...] += jnp.sum(x_ref[...].astype(jnp.float32), axis=1)

    @pl.when(pl.program_id(0) == pl.num_programs(0) - 1)
    def _():
        o_ref[...] = (acc_ref[...] * inv_hw).astype(o_ref.dtype)


def maxpool_3x3_s2_p1(x, max_tm=512):
    """MaxPool2d(kernel=3, stride=2, padding=1), NHWC, tiled over output rows."""
    # TODO(synk): the 9 shifted taps are still materialized by XLA as a (9,M,C)
    # stack; an in-kernel shifted-window gather would need manual DMA.
    N, H, W, C = x.shape
    k, stride, pad = 3, 2, 1
    OH = (H + 2 * pad - k) // stride + 1
    OW = (W + 2 * pad - k) // stride + 1
    neg = jnp.finfo(x.dtype).min
    xp = jnp.pad(x, ((0, 0), (pad, pad), (pad, pad), (0, 0)),
                 constant_values=neg)
    cols = [xp[:, i:i + stride * (OH - 1) + 1:stride,
               j:j + stride * (OW - 1) + 1:stride, :]
            for i in range(k) for j in range(k)]
    M = N * OH * OW
    patches = jnp.stack(cols, axis=0).reshape(k * k, M, C)

    tm = min(max_tm, _round_up(M, 8))
    Mp = _round_up(M, tm)
    patches = jnp.pad(patches, ((0, 0), (0, Mp - M), (0, 0)))

    out = pl.pallas_call(
        _max_reduce_kernel,
        out_shape=jax.ShapeDtypeStruct((Mp, C), x.dtype),
        grid_spec=pltpu.PrefetchScalarGridSpec(
            num_scalar_prefetch=0,
            grid=(Mp // tm,),
            in_specs=[pl.BlockSpec((k * k, tm, C), lambda i: (0, i, 0))],
            out_specs=pl.BlockSpec((tm, C), lambda i: (i, 0))),
        compiler_params=pltpu.CompilerParams(
            dimension_semantics=("parallel",)),
    )(patches)
    return out[:M].reshape(N, OH, OW, C)


def global_avgpool(x, max_thw=512):
    """Adaptive avg pool to (1,1): (N,H,W,C) -> (N,C), tiled sum over HW."""
    N, H, W, C = x.shape
    HW = H * W
    HWp = _round_up(HW, 8)
    xs = jnp.pad(x.reshape(N, HW, C), ((0, 0), (0, HWp - HW), (0, 0)))

    thw = min(max_thw, HWp)
    thw -= thw % 8
    while HWp % thw:
        thw -= 8

    kernel = functools.partial(_avgpool_kernel, inv_hw=1.0 / HW)
    return pl.pallas_call(
        kernel,
        out_shape=jax.ShapeDtypeStruct((N, C), jnp.float32),
        grid_spec=pltpu.PrefetchScalarGridSpec(
            num_scalar_prefetch=0,
            grid=(HWp // thw,),
            in_specs=[pl.BlockSpec((N, thw, C), lambda i: (0, i, 0))],
            out_specs=pl.BlockSpec((N, C), lambda i: (0, 0)),
            scratch_shapes=[pltpu.VMEM((N, C), jnp.float32)]),
        compiler_params=pltpu.CompilerParams(
            dimension_semantics=("arbitrary",)),
    )(xs)


# ---------------------------- conv (im2col) glue -----------------------------

def _im2col(x, kh, kw, stride, pad):
    """x: (N,H,W,C) -> patches (N*OH*OW, kh*kw*C), plus (OH, OW)."""
    # TODO(synk): stride-1 3x3 convs still materialize im2col patches in HBM;
    # an in-kernel tap-as-K-axis shifted-window gather is left out.
    N, H, W, C = x.shape
    OH = (H + 2 * pad - kh) // stride + 1
    OW = (W + 2 * pad - kw) // stride + 1
    xp = jnp.pad(x, ((0, 0), (pad, pad), (pad, pad), (0, 0)))
    cols = []
    for i in range(kh):
        for j in range(kw):
            cols.append(xp[:, i:i + stride * (OH - 1) + 1:stride,
                           j:j + stride * (OW - 1) + 1:stride, :])
    patches = jnp.stack(cols, axis=3).reshape(N * OH * OW, kh * kw * C)
    return patches, OH, OW


def conv2d_bn(x, w, scale, bias, stride, pad, relu=True, residual=None):
    """Conv2d (no bias) + folded BN affine [+ residual] [+ ReLU], fused epilogue.

    x: (N,H,W,Cin) fp32; w: (kh,kw,Cin,Cout) bf16; scale/bias: (Cout,) fp32."""
    N = x.shape[0]
    kh, kw, cin, cout = w.shape
    patches, OH, OW = _im2col(x, kh, kw, stride, pad)
    res = None if residual is None else residual.reshape(-1, cout)
    out = matmul_fused(patches, w.reshape(kh * kw * cin, cout),
                       scale, bias, residual=res, relu=relu)
    return out.reshape(N, OH, OW, cout)


# ------------------------------ ResNet18 model ------------------------------

def init_params(key, num_classes=20):
    keys = iter(jax.random.split(key, 64))

    def conv_w(kh, kw, cin, cout):
        std = (2.0 / (kh * kw * cin)) ** 0.5
        w = std * jax.random.normal(next(keys), (kh, kw, cin, cout), jnp.float32)
        return w.astype(jnp.bfloat16)          # stored bf16 for the MXU

    def bn(c):
        k1, k2 = jax.random.split(next(keys))
        gamma = 1.0 + 0.05 * jax.random.normal(k1, (c,), jnp.float32)
        beta = 0.05 * jax.random.normal(k2, (c,), jnp.float32)
        # fold running stats (mean=0, var=1, eps=1e-5) into scale/bias
        scale = gamma / jnp.sqrt(jnp.float32(1.0 + 1e-5))
        bias = beta
        return scale, bias

    params = {'conv1_w': conv_w(7, 7, 3, 64), 'bn1': bn(64)}
    stages = [(64, 64, 1), (64, 128, 2), (128, 256, 2), (256, 512, 2)]
    blocks = []
    for cin, cout, stride in stages:
        stage_blocks = []
        for bi in range(2):
            s = stride if bi == 0 else 1
            icin = cin if bi == 0 else cout
            blk = {'stride': s,
                   'conv1_w': conv_w(3, 3, icin, cout), 'bn1': bn(cout),
                   'conv2_w': conv_w(3, 3, cout, cout), 'bn2': bn(cout)}
            if s != 1 or icin != cout:
                blk['down_w'] = conv_w(1, 1, icin, cout)
                blk['down_bn'] = bn(cout)
            stage_blocks.append(blk)
        blocks.append(stage_blocks)
    params['blocks'] = blocks
    params['fc_w'] = (0.05 * jax.random.normal(
        next(keys), (512, num_classes), jnp.float32)).astype(jnp.bfloat16)
    params['fc_b'] = 0.05 * jax.random.normal(
        next(keys), (num_classes,), jnp.float32)
    return params


def basic_block(x, blk):
    stride = blk['stride']
    s1, b1 = blk['bn1']
    s2, b2 = blk['bn2']
    out = conv2d_bn(x, blk['conv1_w'], s1, b1, stride=stride, pad=1, relu=True)
    if 'down_w' in blk:
        ds, db = blk['down_bn']
        idn = conv2d_bn(x, blk['down_w'], ds, db, stride=stride, pad=0, relu=False)
    else:
        idn = x
    # conv2 + bn2 + residual add + relu all fused in the matmul epilogue
    out = conv2d_bn(out, blk['conv2_w'], s2, b2, stride=1, pad=1,
                    relu=True, residual=idn)
    return out


def resnet18_forward(x_nchw, params):
    """x_nchw: (N, 3, H, W) float32 -> logits (N, num_classes)."""
    x = jnp.transpose(x_nchw, (0, 2, 3, 1)).astype(jnp.float32)  # NCHW -> NHWC
    # stem: conv7x7/2 + bn + relu (fused) + maxpool3x3/2
    s, b = params['bn1']
    x = conv2d_bn(x, params['conv1_w'], s, b, stride=2, pad=3, relu=True)
    x = maxpool_3x3_s2_p1(x)
    # 4 stages x 2 basic blocks
    for stage in params['blocks']:
        for blk in stage:
            x = basic_block(x, blk)
    # head: global avg pool + fc (bias fused as epilogue with scale=1)
    feats = global_avgpool(x)                                    # (N, 512)
    ones = jnp.ones((params['fc_b'].shape[0],), jnp.float32)
    logits = matmul_fused(feats, params['fc_w'], ones, params['fc_b'], relu=False)
    return logits


if __name__ == "__main__":
    key = jax.random.PRNGKey(0)
    pkey, xkey = jax.random.split(key)
    params = init_params(pkey, num_classes=20)
    x = jax.random.normal(xkey, (2, 3, 32, 32), jnp.float32)  # small NCHW input
    logits = resnet18_forward(x, params)
    logits = jax.block_until_ready(logits)
    assert logits.shape == (2, 20) and logits.dtype == jnp.float32
    assert bool(jnp.all(jnp.isfinite(logits)))
    print("KERNEL_OK")
</pallas_src>

<mosaic_0001>
module attributes {stable_mosaic.version = 11 : i64} {
  func.func @_mm_bn_kernel(%arg0: i32, %arg1: i32, %arg2: i32, %arg3: memref<256x152xbf16, #tpu.memory_space<vmem>>, %arg4: memref<152x128xbf16, #tpu.memory_space<vmem>>, %arg5: memref<1x128xf32, #tpu.memory_space<vmem>>, %arg6: memref<1x128xf32, #tpu.memory_space<vmem>>, %arg7: memref<256x128xf32, #tpu.memory_space<vmem>>, %arg8: memref<256x128xf32, #tpu.memory_space<vmem>>) attributes {dimension_semantics = [#tpu.dimension_semantics<parallel>, #tpu.dimension_semantics<parallel>, #tpu.dimension_semantics<arbitrary>], iteration_bounds = array<i64: 2, 1, 1>, scalar_prefetch = 0 : i64, scratch_operands = 1 : i64, tpu.core_type = #tpu.core_type<tc>, window_params = [{transform_indices = @transform_0, window_bounds = array<i64: 256, 152>}, {transform_indices = @transform_1, window_bounds = array<i64: 152, 128>}, {transform_indices = @transform_2, window_bounds = array<i64: 1, 128>}, {transform_indices = @transform_3, window_bounds = array<i64: 1, 128>}, {transform_indices = @transform_4, window_bounds = array<i64: 256, 128>}]} {
    %c0_i32 = arith.constant 0 : i32
    %0 = arith.cmpi eq, %arg2, %c0_i32 : i32
    %1 = arith.extui %0 : i1 to i32
    %c0_i32_0 = arith.constant 0 : i32
    %2 = arith.cmpi ne, %1, %c0_i32_0 : i32
    scf.if %2 {
      %cst_10 = arith.constant 0.000000e+00 : f32
      %12 = vector.broadcast %cst_10 : f32 to vector<256x128xf32>
      %c0_11 = arith.constant 0 : index
      %c0_12 = arith.constant 0 : index
      %13 = vector.load %arg8[%c0_11, %c0_12] : memref<256x128xf32, #tpu.memory_space<vmem>>, vector<256x128xf32>
      tpu.vector_store %arg8[%c0_11, %c0_12], %12 {strides = array<i32>} : memref<256x128xf32, #tpu.memory_space<vmem>>, vector<256x128xf32>,
    } else {
    }
    %c0 = arith.constant 0 : index
    %c0_1 = arith.constant 0 : index
    %3 = vector.load %arg8[%c0, %c0_1] : memref<256x128xf32, #tpu.memory_space<vmem>>, vector<256x128xf32>
    %c0_2 = arith.constant 0 : index
    %c0_3 = arith.constant 0 : index
    %4 = vector.load %arg3[%c0_2, %c0_3] : memref<256x152xbf16, #tpu.memory_space<vmem>>, vector<256x152xbf16>
    %c0_4 = arith.constant 0 : index
    %c0_5 = arith.constant 0 : index
    %5 = vector.load %arg4[%c0_4, %c0_5] : memref<152x128xbf16, #tpu.memory_space<vmem>>, vector<152x128xbf16>
    %cst = arith.constant dense<0.000000e+00> : vector<256x128xf32>
    %6 = tpu.matmul %4, %5, %cst {dimension_numbers = #tpu.dot_dimension_numbers<[1], [0], [0], [1], [0, 0, 1, 1], [], []>} : vector<256x152xbf16>, vector<152x128xbf16>, vector<256x128xf32> -> vector<256x128xf32>
    %7 = arith.addf %3, %6 : vector<256x128xf32>
    %c0_6 = arith.constant 0 : index
    %c0_7 = arith.constant 0 : index
    %8 = vector.load %arg8[%c0_6, %c0_7] : memref<256x128xf32, #tpu.memory_space<vmem>>, vector<256x128xf32>
    tpu.vector_store %arg8[%c0_6, %c0_7], %7 {strides = array<i32>} : memref<256x128xf32, #tpu.memory_space<vmem>>, vector<256x128xf32>,
    %c0_i32_8 = arith.constant 0 : i32
    %9 = arith.cmpi eq, %arg2, %c0_i32_8 : i32
    %10 = arith.extui %9 : i1 to i32
    %c0_i32_9 = arith.constant 0 : i32
    %11 = arith.cmpi ne, %10, %c0_i32_9 : i32
    scf.if %11 {
      %c0_10 = arith.constant 0 : index
      %c0_11 = arith.constant 0 : index
      %12 = vector.load %arg8[%c0_10, %c0_11] : memref<256x128xf32, #tpu.memory_space<vmem>>, vector<256x128xf32>
      %c0_12 = arith.constant 0 : index
      %c0_13 = arith.constant 0 : index
      %13 = vector.load %arg5[%c0_12, %c0_13] : memref<1x128xf32, #tpu.memory_space<vmem>>, vector<1x128xf32>
      %14 = vector.broadcast %13 : vector<1x128xf32> to vector<256x128xf32>
      %15 = arith.mulf %12, %14 : vector<256x128xf32>
      %c0_14 = arith.constant 0 : index
      %c0_15 = arith.constant 0 : index
      %16 = vector.load %arg6[%c0_14, %c0_15] : memref<1x128xf32, #tpu.memory_space<vmem>>, vector<1x128xf32>
      %17 = vector.broadcast %16 : vector<1x128xf32> to vector<256x128xf32>
      %18 = arith.addf %15, %17 : vector<256x128xf32>
      %cst_16 = arith.constant 0.000000e+00 : f32
      %19 = vector.broadcast %cst_16 : f32 to vector<256x128xf32>
      %20 = arith.maximumf %18, %19 : vector<256x128xf32>
      %c0_17 = arith.constant 0 : index
      %c0_18 = arith.constant 0 : index
      %21 = vector.load %arg7[%c0_17, %c0_18] : memref<256x128xf32, #tpu.memory_space<vmem>>, vector<256x128xf32>
      tpu.vector_store %arg7[%c0_17, %c0_18], %20 {strides = array<i32>} : memref<256x128xf32, #tpu.memory_space<vmem>>, vector<256x128xf32>,
    } else {
    }
    return
  }
  func.func @transform_0(%arg0: i32, %arg1: i32, %arg2: i32) -> (i32, i32) {
    %c0_i32 = arith.constant 0 : i32
    return %arg0, %arg2 : i32, i32
  }
  func.func @transform_1(%arg0: i32, %arg1: i32, %arg2: i32) -> (i32, i32) {
    %c0_i32 = arith.constant 0 : i32
    return %arg2, %arg1 : i32, i32
  }
  func.func @transform_2(%arg0: i32, %arg1: i32, %arg2: i32) -> (i32, i32) {
    %c0_i32 = arith.constant 0 : i32
    %c0_i32_0 = arith.constant 0 : i32
    return %c0_i32, %arg1 : i32, i32
  }
  func.func @transform_3(%arg0: i32, %arg1: i32, %arg2: i32) -> (i32, i32) {
    %c0_i32 = arith.constant 0 : i32
    %c0_i32_0 = arith.constant 0 : i32
    return %c0_i32, %arg1 : i32, i32
  }
  func.func @transform_4(%arg0: i32, %arg1: i32, %arg2: i32) -> (i32, i32) {
    %c0_i32 = arith.constant 0 : i32
    return %arg0, %arg1 : i32, i32
  }
}

</mosaic_0001>

<bundles_post_ra>
// kernel: tpu_custom_call.1
= control target key start
LH: loop header
LB: loop body
LE: loop exit
PB: predicated region body
PF: predicated region fallthrough
CT: control target
= control target key end

     0   :  { %9 = vsyncpa [#allocation4], 0  ;;  %s1842_s0 = inlined_call_operand.vmem [shape: bf16[512,152], index: 0, kind: input, shape index: {}]   ;;  %s1843_s1 = inlined_call_operand.vmem [shape: bf16[152,128], index: 1, kind: input, shape index: {}]   ;;  %s1844_s2 = inlined_call_operand.vmem [shape: f32[1,128], index: 2, kind: input, shape index: {}]   ;;  %s1845_s3 = inlined_call_operand.vmem [shape: f32[1,128], index: 3, kind: input, shape index: {}]   ;;  %s1846_s4 = inlined_call_operand.hbm [shape: f32[512,128], index: 4, kind: output, shape index: {}]  }
   0x1   :  { %11 = vsyncpa [#allocation4 + $0x1], 0  ;;  %s1536_s15 = smov 0   ;;  %s1538_s16 = smov 0  }
   0x2   :  { %s1540_s17 = smov 0   ;;  %s1542_s18 = smov 0  }
   0x3   :  { %s1544_s19 = smov 0   ;;  %s1546_s20 = smov 0  }
   0x4 LB: > { %s1214_s21 = sadd.s32 4294967295, %s1505_s20   ;;  %s1215_s22 = sadd.s32 4294967294, %s1505_s20   ;;  %s1505_s20 = sphi %s1546_s20, %s17_s20   ;;  %s1501_s19 = sphi %s1544_s19, %s1853_s19   ;;  %s1497_s18 = sphi %s1542_s18, %s1852_s18   ;;  %s1493_s17 = sphi %s1540_s17, %s1851_s17   ;;  %s1489_s16 = sphi %s1538_s16, %s1850_s16   ;;  %s1485_s15 = sphi %s1536_s15, %s1849_s15  }
   0x5   : > { %s36_s23 = sadd.s32 1, %s1501_s19  ;;  %s153_s24 = sadd.s32 1, %s1493_s17 }
   0x6   : > { %p38_p0 = scmp.ge.s32.totalorder %s36_s23, 2  ;;  %p163_p1 = scmp.ne.s32.totalorder %s1493_s17, %s1489_s16 }
   0x7   : > { %p164_p2 = scmp.eq.s32.totalorder %s1214_s21, 1  ;;  %p169_p3 = scmp.ne.s32.totalorder %s1489_s16, %s1485_s15 }
   0x8   : > { %s1855_s23 = smov (%p38_p0, %s36_s23), 0  ;;  %p170_p5 = scmp.eq.s32.totalorder %s1215_s22, 1 }
   0x9   : > { %p1576_p4 = por %p164_p2, %p163_p1  ;;  %s148_s26 = ssub.s32 %s1501_s19, %s1855_s23 }
   0xa   : > { %p1221_p6 = scmp.ge.s32.totalorder %s1505_s20, 1  ;;  %p151_p7 = scmp.eq.s32.totalorder %s148_s26, 0 }
   0xb   : > { %p1583_p8 = por %p170_p5, %p169_p3  ;;  %p227_p9 = scmp.lt.s32.totalorder %s1505_s20, 3 }
   0xc   : > { %s1589_s28 = scalar_select %p151_p7, %s1493_s17, %s153_s24  }
   0xd   : > { %p228_p10 = pnand %p1221_p6, %p227_p9 }
   0xe   : > { %s1223_s7 = sshll.u32 (!%p228_p10), %s1497_s18, 5  ;;  %s269_s12 = sand.u32 (!%p228_p10), 1, %s1489_s16  }
   0xf   : > { %231 = sbr.rel (%p228_p10) target bundleno = 334 (0x14e), region = 36  ;;  %p274_p11 = scmp.lt.s32.totalorder (!%p228_p10), %s1223_s7, 63 }
  0x10   : > { %s1222_s26 = sshll.u32 (!%p228_p10), %s269_s12, 8  ;;  %s1292_s29 = sshll.u32 (!%p228_p10), %s1497_s18, 12 }
  0x11   : > { %s1797_s18 = scalar_lea.sflag (!%p228_p10), [#allocation4], %s269_s12  ;;  %s1508_s9 = smov (!%p228_p10), [#allocation3]  }
  0x14   : > { %v1371_v0 = vld [vmem:[%s1843_s1 + $0x38] sm:$0xff]   ;;  %v1507_v1 = vmov 0   ;;  %v1372_v2 = vld [vmem:[%s1843_s1 + $0x30] sm:$0xff]   ;;  %s1857_s7 = smov (!%p274_p11, %s1223_s7), 63  ;;  %v1373_v3 = vld [vmem:[%s1843_s1 + $0x28] sm:$0xff]   ;;  %vm621_vm0 = vcmask 195584  }
  0x15   : > { %674 = vmatprep.subr.bf16.mxu0 %v1507_v1  ;;  %1293 = vmatprep.subr.bf16.mxu1 %v1507_v1  ;;  %s1291_s10 = sshll.u32 %s1857_s7, 3  ;;  %v1374_v4 = vld [vmem:[%s1843_s1 + $0x20] sm:$0xff]   ;;  %v1375_v7 = vld [vmem:[%s1843_s1 + $0x18] sm:$0xff]   ;;  %v1376_v8 = vld [vmem:[%s1843_s1 + $0x10] sm:$0xff]   ;;  %vm670_vm1 = vcmask 1043456   ;;  %s1789_s7 = scalar_lea.hbm %s1846_s4, %s1292_s29 }
  0x16   : > { %675 = vmatpush1.bf16.msra.mxu0 %v1371_v0  ;;  %1303 = vmatpush1.bf16.msra.mxu1 %v1371_v0  ;;  %s1604_s13 = scalar_lea.vmem %s1842_s0, %s1291_s10  ;;  %v1377_v9 = vld [vmem:[%s1843_s1 + $0x8] sm:$0xff]   ;;  %v1378_v10 = vld [vmem:[%s1843_s1] sm:$0xff]   ;;  %s1433_s10 = sshll.u32 %s1508_s9, 4  ;;  %s1434_s10 = int_to_ptr.vmem [resolvable:$false] %s1433_s10 }
  0x17   : > { %676 = vmatprep.subr.bf16.mxu0 %v1507_v1  ;;  %1294 = vmatprep.subr.bf16.mxu1 %v1507_v1  ;;  %v1383_v5 = vld [vmem:[%s1604_s13 + $0x4] ss:$8 sps:$4 sm:$0xff]   ;;  %v1379_v11 = vld [vmem:[%s1843_s1 + $0x48] ss:$0 sps:$4 sm:$0xff]   ;;  %v1387_v16 = vld [vmem:[%s1604_s13 + $0x14] ss:$8 sps:$4 sm:$0xff]  }
  0x18   : > { %1268 = vmatprep.mubr.msk.bf16.mxu0 %vm621_vm0, %v1383_v5  ;;  %v1386_v6 = vld [vmem:[%s1604_s13 + $0x84] ss:$8 sps:$4 sm:$0xff]   ;;  %v672_v12 = vsel %vm670_vm1, %v1379_v11, 0  ;;  %v1381_v14 = vld [vmem:[%s1604_s13] ss:$8 sps:$4 sm:$0xff]   ;;  %s1435_s11 = scalar_lea.vmem %s1434_s10, 8192 }
  0x19   : > { %1276 = vmatprep.mubr.msk.bf16.mxu1 %vm621_vm0, %v1386_v6  ;;  %v1380_v13 = vld [vmem:[%s1843_s1 + $0x40] sm:$0xff]   ;;  %v1389_v17 = vld [vmem:[%s1604_s13 + $0x94] ss:$8 sps:$4 sm:$0xff]   ;;  %v1391_v18 = vld [vmem:[%s1604_s13 + $0x10] ss:$8 sps:$4 sm:$0xff]  }
  0x1a   : > { %677 = vmatpush1.bf16.msra.mxu0 %v1372_v2  ;;  %1304 = vmatpush1.bf16.msra.mxu1 %v1372_v2  ;;  %v1384_v15 = vld [vmem:[%s1604_s13 + $0x80] ss:$8 sps:$4 sm:$0xff]   ;;  %v1392_v19 = vld [vmem:[%s1604_s13 + $0x90] ss:$8 sps:$4 sm:$0xff]   ;;  %v1393_v20 = vld [vmem:[%s1604_s13 + $0x24] ss:$8 sps:$4 sm:$0xff]  }
  0x1b   : > { %678 = vmatprep.subr.bf16.mxu0 %v1507_v1  ;;  %1295 = vmatprep.subr.bf16.mxu1 %v1507_v1  ;;  %v1395_v21 = vld [vmem:[%s1604_s13 + $0xa4] ss:$8 sps:$4 sm:$0xff]   ;;  %v1397_v22 = vld [vmem:[%s1604_s13 + $0x20] ss:$8 sps:$4 sm:$0xff]   ;;  %v1399_v24 = vld [vmem:[%s1604_s13 + $0x34] ss:$8 sps:$4 sm:$0xff]  }
  0x1c   : > { %v1398_v23 = vld [vmem:[%s1604_s13 + $0xa0] ss:$8 sps:$4 sm:$0xff]   ;;  %v1401_v25 = vld [vmem:[%s1604_s13 + $0xb4] ss:$8 sps:$4 sm:$0xff]   ;;  %v1403_v26 = vld [vmem:[%s1604_s13 + $0x30] ss:$8 sps:$4 sm:$0xff]  }
  0x1d   : > { %v1404_v27 = vld [vmem:[%s1604_s13 + $0xb0] ss:$8 sps:$4 sm:$0xff]   ;;  %v1405_v28 = vld [vmem:[%s1604_s13 + $0x44] ss:$8 sps:$4 sm:$0xff]   ;;  %v1409_v30 = vld [vmem:[%s1604_s13 + $0x40] ss:$8 sps:$4 sm:$0xff]  }
  0x1e   : > { %679 = vmatpush1.bf16.msra.mxu0 %v1373_v3  ;;  %1305 = vmatpush1.bf16.msra.mxu1 %v1373_v3  ;;  %v1407_v29 = vld [vmem:[%s1604_s13 + $0xc4] ss:$8 sps:$4 sm:$0xff]   ;;  %v1410_v31 = vld [vmem:[%s1604_s13 + $0xc0] ss:$8 sps:$4 sm:$0xff]   ;;  %v1411_v32 = vld [vmem:[%s1604_s13 + $0x54] ss:$8 sps:$4 sm:$0xff]  }
  0x1f   : > { %680 = vmatprep.subr.bf16.mxu0 %v1507_v1  ;;  %1296 = vmatprep.subr.bf16.mxu1 %v1507_v1  ;;  %v1413_v33 = vld [vmem:[%s1604_s13 + $0xd4] ss:$8 sps:$4 sm:$0xff]   ;;  %v1415_v34 = vld [vmem:[%s1604_s13 + $0x50] ss:$8 sps:$4 sm:$0xff]   ;;  %v1417_v36 = vld [vmem:[%s1604_s13 + $0x64] ss:$8 sps:$4 sm:$0xff]  }
  0x20   : > { %v1416_v35 = vld [vmem:[%s1604_s13 + $0xd0] ss:$8 sps:$4 sm:$0xff]   ;;  %v1419_v37 = vld [vmem:[%s1604_s13 + $0xe4] ss:$8 sps:$4 sm:$0xff]   ;;  %v1421_v38 = vld [vmem:[%s1604_s13 + $0x60] ss:$8 sps:$4 sm:$0xff]  }
  0x21   : > { %v1422_v39 = vld [vmem:[%s1604_s13 + $0xe0] ss:$8 sps:$4 sm:$0xff]   ;;  %v1423_v40 = vld [vmem:[%s1604_s13 + $0x74] ss:$8 sps:$4 sm:$0xff]   ;;  %v1427_v42 = vld [vmem:[%s1604_s13 + $0x70] ss:$8 sps:$4 sm:$0xff]  }
  0x22   : > { %681 = vmatpush1.bf16.msra.mxu0 %v1374_v4  ;;  %1306 = vmatpush1.bf16.msra.mxu1 %v1374_v4  ;;  %v1425_v41 = vld [vmem:[%s1604_s13 + $0xf4] ss:$8 sps:$4 sm:$0xff]   ;;  %v1428_v43 = vld [vmem:[%s1604_s13 + $0xf0] ss:$8 sps:$4 sm:$0xff]   ;;  %v1679_v44 = vld [vmem:[%s1844_s2] ss:$0 sm:$0xff] }
  0x23   : > { %682 = vmatprep.subr.bf16.mxu0 %v1507_v1  ;;  %1297 = vmatprep.subr.bf16.mxu1 %v1507_v1  ;;  %v1684_v46 = vld [vmem:[%s1845_s3] ss:$0 sm:$0xff]  ;;  %s1694_s13 = scalar_lea.vmem [#allocation3], %s1222_s26 }
  0x24   : > { %s1091_s30 = sshll.u32 %s1694_s13, 4  ;;  %s1791_s30 = int_to_ptr.vmem [resolvable:$true] %s1091_s30 }
  0x25   : > { %s1429_s8 = scalar_lea.vmem %s1791_s30, 4096  ;;  %p1436_p1 = scmp.lt.s32.totalorder %s1791_s30, %s1434_s10 }
  0x26   : > { %683 = vmatpush1.bf16.msra.mxu0 %v1375_v7  ;;  %1307 = vmatpush1.bf16.msra.mxu1 %v1375_v7  ;;  %p1430_p12 = scmp.ne.s32.totalorder %s1791_s30, %s1429_s8  ;;  %p1437_p2 = scmp.lt.s32.totalorder %s1435_s11, %s1429_s8 }
  0x27   : > { %684 = vmatprep.subr.bf16.mxu0 %v1507_v1  ;;  %1298 = vmatprep.subr.bf16.mxu1 %v1507_v1 }
  0x28   : > { %p1431_p13 = pnand %p1430_p12, %p1576_p4  ;;  %p1438_p3 = por %p1437_p2, %p1436_p1 }
  0x2a   : > { %685 = vmatpush1.bf16.msra.mxu0 %v1376_v8  ;;  %1308 = vmatpush1.bf16.msra.mxu1 %v1376_v8  ;;  %p1432_p0 = pneg %p1431_p13 }
  0x2b   : > { %686 = vmatprep.subr.bf16.mxu0 %v1507_v1  ;;  %1299 = vmatprep.subr.bf16.mxu1 %v1507_v1 }
  0x2c   : > { %p1439_p5 = pnand %p1438_p3, %p1432_p0 }
  0x2e   : > { %687 = vmatpush1.bf16.msra.mxu0 %v1377_v9  ;;  %1309 = vmatpush1.bf16.msra.mxu1 %v1377_v9 }
  0x2f   : > { %688 = vmatprep.subr.bf16.mxu0 %v1507_v1  ;;  %1300 = vmatprep.subr.bf16.mxu1 %v1507_v1 }
  0x32   : > { %689 = vmatpush1.bf16.msra.mxu0 %v1378_v10  ;;  %1310 = vmatpush1.bf16.msra.mxu1 %v1378_v10 }
  0x33   : > { %702 = vmatprep.subr.bf16.mxu0 %v1507_v1  ;;  %1301 = vmatprep.subr.bf16.mxu1 %v1507_v1 }
  0x36   : > { %703 = vmatpush2.bf16.msra.mxu0 %v672_v12  ;;  %1311 = vmatpush2.bf16.msra.mxu1 %v672_v12 }
  0x37   : > { %704 = vmatprep.subr.bf16.mxu0 %v1507_v1  ;;  %1302 = vmatprep.subr.bf16.mxu1 %v1507_v1 }
  0x3a   : > { %705 = vmatpush2.bf16.msra.mxu0 %v1380_v13  ;;  %1312 = vmatpush2.bf16.msra.mxu1 %v1380_v13 }
  0x3d   : > { %707 = vmatmul.mubr.bf16.vlgmr.msra.gmra.mxu0 %v1381_v14  ;;  %771 = vmatmul.mubr.bf16.vlgmr.msra.gmra.mxu1 %v1384_v15 }
  0x3e   : > { %1269 = vmatprep.mubr.msk.bf16.mxu0 %vm621_vm0, %v1387_v16  ;;  %1277 = vmatprep.mubr.msk.bf16.mxu1 %vm621_vm0, %v1389_v17 }
  0x45   : > { %715 = vmatmul.mubr.bf16.gmra.mxu0 %v1391_v18  ;;  %779 = vmatmul.mubr.bf16.gmra.mxu1 %v1392_v19 }
  0x46   : > { %1270 = vmatprep.mubr.msk.bf16.mxu0 %vm621_vm0, %v1393_v20  ;;  %1278 = vmatprep.mubr.msk.bf16.mxu1 %vm621_vm0, %v1395_v21 }
  0x4d   : > { %723 = vmatmul.mubr.bf16.gmra.mxu0 %v1397_v22  ;;  %787 = vmatmul.mubr.bf16.gmra.mxu1 %v1398_v23 }
  0x4e   : > { %1271 = vmatprep.mubr.msk.bf16.mxu0 %vm621_vm0, %v1399_v24  ;;  %1279 = vmatprep.mubr.msk.bf16.mxu1 %vm621_vm0, %v1401_v25 }
  0x55   : > { %731 = vmatmul.mubr.bf16.gmra.mxu0 %v1403_v26  ;;  %795 = vmatmul.mubr.bf16.gmra.mxu1 %v1404_v27 }
  0x56   : > { %1272 = vmatprep.mubr.msk.bf16.mxu0 %vm621_vm0, %v1405_v28  ;;  %1280 = vmatprep.mubr.msk.bf16.mxu1 %vm621_vm0, %v1407_v29 }
  0x5d   : > { %739 = vmatmul.mubr.bf16.gmra.mxu0 %v1409_v30  ;;  %803 = vmatmul.mubr.bf16.gmra.mxu1 %v1410_v31 }
  0x5e   : > { %1273 = vmatprep.mubr.msk.bf16.mxu0 %vm621_vm0, %v1411_v32  ;;  %1281 = vmatprep.mubr.msk.bf16.mxu1 %vm621_vm0, %v1413_v33 }
  0x65   : > { %747 = vmatmul.mubr.bf16.gmra.mxu0 %v1415_v34  ;;  %811 = vmatmul.mubr.bf16.gmra.mxu1 %v1416_v35 }
  0x66   : > { %1274 = vmatprep.mubr.msk.bf16.mxu0 %vm621_vm0, %v1417_v36  ;;  %1282 = vmatprep.mubr.msk.bf16.mxu1 %vm621_vm0, %v1419_v37 }
  0x6d   : > { %755 = vmatmul.mubr.bf16.gmra.mxu0 %v1421_v38  ;;  %819 = vmatmul.mubr.bf16.gmra.mxu1 %v1422_v39 }
  0x6e   : > { %1275 = vmatprep.mubr.msk.bf16.mxu0 %vm621_vm0, %v1423_v40  ;;  %1283 = vmatprep.mubr.msk.bf16.mxu1 %vm621_vm0, %v1425_v41 }
  0x75   : > { %763 = vmatmul.mubr.bf16.gmra.mxu0 %v1427_v42  ;;  %827 = vmatmul.mubr.bf16.gmra.mxu1 %v1428_v43 }
  0xfd   : > { %v708_v45 = vpop.f32.mrf.mxu0  ;;  %v772_v47 = vpop.f32.mrf.mxu1 }
  0xfe   : > { %v941_v48 = vmul.f32 %v1679_v44, %v708_v45  ;;  %v957_v49 = vmul.f32 %v1679_v44, %v772_v47 }
  0xff   : > { %v710_v50 = vpop.f32.mrf.mxu0  ;;  %v774_v51 = vpop.f32.mrf.mxu1 }
 0x100   : > { %v980_v52 = vadd.f32 %v1684_v46, %v941_v48  ;;  %v996_v53 = vadd.f32 %v1684_v46, %v957_v49 }
 0x101   : > { %v711_v54 = vpop.f32.mrf.mxu0  ;;  %v775_v55 = vpop.f32.mrf.mxu1 }
 0x102   : > { %v1012_v56 = vmax.f32 %v980_v52, 0.0  ;;  %v1028_v57 = vmax.f32 %v996_v53, 0.0  ;;  %v942_v58 = vmul.f32 %v1679_v44, %v711_v54  ;;  %v958_v59 = vmul.f32 %v1679_v44, %v775_v55 }
 0x103   : > { %v713_v60 = vpop.f32.mrf.mxu0  ;;  %v777_v61 = vpop.f32.mrf.mxu1 }
 0x104   : > { %1044 = vst [vmem:[%s1694_s13] sm:$0xff] %v1012_v56  ;;  %1060 = vst [vmem:[%s1694_s13 + $0x80] sm:$0xff] %v1028_v57  ;;  %v981_v62 = vadd.f32 %v1684_v46, %v942_v58  ;;  %v997_v63 = vadd.f32 %v1684_v46, %v958_v59 }
 0x105   : > { %v716_v0 = vpop.f32.mrf.mxu0  ;;  %v780_v1 = vpop.f32.mrf.mxu1 }
 0x106   : > { %v1013_v2 = vmax.f32 %v981_v62, 0.0  ;;  %v1029_v3 = vmax.f32 %v997_v63, 0.0  ;;  %v943_v4 = vmul.f32 %v1679_v44, %v716_v0  ;;  %v959_v5 = vmul.f32 %v1679_v44, %v780_v1 }
 0x107   : > { %v718_v6 = vpop.f32.mrf.mxu0  ;;  %v782_v7 = vpop.f32.mrf.mxu1 }
 0x108   : > { %1045 = vst [vmem:[%s1694_s13 + $0x8] sm:$0xff] %v1013_v2  ;;  %1061 = vst [vmem:[%s1694_s13 + $0x88] sm:$0xff] %v1029_v3  ;;  %v982_v8 = vadd.f32 %v1684_v46, %v943_v4  ;;  %v998_v9 = vadd.f32 %v1684_v46, %v959_v5 }
 0x109   : > { %v719_v10 = vpop.f32.mrf.mxu0  ;;  %v783_v11 = vpop.f32.mrf.mxu1 }
 0x10a   : > { %v1014_v12 = vmax.f32 %v982_v8, 0.0  ;;  %v1030_v13 = vmax.f32 %v998_v9, 0.0  ;;  %v944_v14 = vmul.f32 %v1679_v44, %v719_v10  ;;  %v960_v15 = vmul.f32 %v1679_v44, %v783_v11 }
 0x10b   : > { %v721_v16 = vpop.f32.mrf.mxu0  ;;  %v785_v17 = vpop.f32.mrf.mxu1 }
 0x10c   : > { %1046 = vst [vmem:[%s1694_s13 + $0x10] sm:$0xff] %v1014_v12  ;;  %1062 = vst [vmem:[%s1694_s13 + $0x90] sm:$0xff] %v1030_v13  ;;  %v983_v18 = vadd.f32 %v1684_v46, %v944_v14  ;;  %v999_v19 = vadd.f32 %v1684_v46, %v960_v15 }
 0x10d   : > { %v724_v20 = vpop.f32.mrf.mxu0  ;;  %v788_v21 = vpop.f32.mrf.mxu1 }
 0x10e   : > { %v1015_v22 = vmax.f32 %v983_v18, 0.0  ;;  %v1031_v23 = vmax.f32 %v999_v19, 0.0  ;;  %v945_v24 = vmul.f32 %v1679_v44, %v724_v20  ;;  %v961_v25 = vmul.f32 %v1679_v44, %v788_v21 }
 0x10f   : > { %v726_v26 = vpop.f32.mrf.mxu0  ;;  %v790_v27 = vpop.f32.mrf.mxu1 }
 0x110   : > { %1047 = vst [vmem:[%s1694_s13 + $0x18] sm:$0xff] %v1015_v22  ;;  %1063 = vst [vmem:[%s1694_s13 + $0x98] sm:$0xff] %v1031_v23  ;;  %v984_v28 = vadd.f32 %v1684_v46, %v945_v24  ;;  %v1000_v29 = vadd.f32 %v1684_v46, %v961_v25 }
 0x111   : > { %v727_v30 = vpop.f32.mrf.mxu0  ;;  %v791_v31 = vpop.f32.mrf.mxu1 }
 0x112   : > { %v1016_v32 = vmax.f32 %v984_v28, 0.0  ;;  %v1032_v33 = vmax.f32 %v1000_v29, 0.0  ;;  %v946_v34 = vmul.f32 %v1679_v44, %v727_v30  ;;  %v962_v35 = vmul.f32 %v1679_v44, %v791_v31 }
 0x113   : > { %v729_v36 = vpop.f32.mrf.mxu0  ;;  %v793_v37 = vpop.f32.mrf.mxu1 }
 0x114   : > { %1048 = vst [vmem:[%s1694_s13 + $0x20] sm:$0xff] %v1016_v32  ;;  %1064 = vst [vmem:[%s1694_s13 + $0xa0] sm:$0xff] %v1032_v33  ;;  %v985_v38 = vadd.f32 %v1684_v46, %v946_v34  ;;  %v1001_v39 = vadd.f32 %v1684_v46, %v962_v35 }
 0x115   : > { %v732_v40 = vpop.f32.mrf.mxu0  ;;  %v796_v41 = vpop.f32.mrf.mxu1 }
 0x116   : > { %v1017_v42 = vmax.f32 %v985_v38, 0.0  ;;  %v1033_v43 = vmax.f32 %v1001_v39, 0.0  ;;  %v947_v45 = vmul.f32 %v1679_v44, %v732_v40  ;;  %v963_v47 = vmul.f32 %v1679_v44, %v796_v41 }
 0x117   : > { %v734_v48 = vpop.f32.mrf.mxu0  ;;  %v798_v49 = vpop.f32.mrf.mxu1 }
 0x118   : > { %1049 = vst [vmem:[%s1694_s13 + $0x28] sm:$0xff] %v1017_v42  ;;  %1065 = vst [vmem:[%s1694_s13 + $0xa8] sm:$0xff] %v1033_v43  ;;  %v986_v50 = vadd.f32 %v1684_v46, %v947_v45  ;;  %v1002_v51 = vadd.f32 %v1684_v46, %v963_v47 }
 0x119   : > { %v735_v52 = vpop.f32.mrf.mxu0  ;;  %v799_v53 = vpop.f32.mrf.mxu1 }
 0x11a   : > { %v1018_v54 = vmax.f32 %v986_v50, 0.0  ;;  %v1034_v55 = vmax.f32 %v1002_v51, 0.0  ;;  %v948_v56 = vmul.f32 %v1679_v44, %v735_v52  ;;  %v964_v57 = vmul.f32 %v1679_v44, %v799_v53 }
 0x11b   : > { %v737_v58 = vpop.f32.mrf.mxu0  ;;  %v801_v59 = vpop.f32.mrf.mxu1 }
 0x11c   : > { %1050 = vst [vmem:[%s1694_s13 + $0x30] sm:$0xff] %v1018_v54  ;;  %1066 = vst [vmem:[%s1694_s13 + $0xb0] sm:$0xff] %v1034_v55  ;;  %v987_v60 = vadd.f32 %v1684_v46, %v948_v56  ;;  %v1003_v61 = vadd.f32 %v1684_v46, %v964_v57 }
 0x11d   : > { %v740_v62 = vpop.f32.mrf.mxu0  ;;  %v804_v63 = vpop.f32.mrf.mxu1 }
 0x11e   : > { %v1019_v0 = vmax.f32 %v987_v60, 0.0  ;;  %v1035_v1 = vmax.f32 %v1003_v61, 0.0  ;;  %v949_v2 = vmul.f32 %v1679_v44, %v740_v62  ;;  %v965_v3 = vmul.f32 %v1679_v44, %v804_v63 }
 0x11f   : > { %v742_v4 = vpop.f32.mrf.mxu0  ;;  %v806_v5 = vpop.f32.mrf.mxu1 }
 0x120   : > { %1051 = vst [vmem:[%s1694_s13 + $0x38] sm:$0xff] %v1019_v0  ;;  %1067 = vst [vmem:[%s1694_s13 + $0xb8] sm:$0xff] %v1035_v1  ;;  %v988_v6 = vadd.f32 %v1684_v46, %v949_v2  ;;  %v1004_v7 = vadd.f32 %v1684_v46, %v965_v3 }
 0x121   : > { %v743_v8 = vpop.f32.mrf.mxu0  ;;  %v807_v9 = vpop.f32.mrf.mxu1 }
 0x122   : > { %v1020_v10 = vmax.f32 %v988_v6, 0.0  ;;  %v1036_v11 = vmax.f32 %v1004_v7, 0.0  ;;  %v950_v12 = vmul.f32 %v1679_v44, %v743_v8  ;;  %v966_v13 = vmul.f32 %v1679_v44, %v807_v9 }
 0x123   : > { %v745_v14 = vpop.f32.mrf.mxu0  ;;  %v809_v15 = vpop.f32.mrf.mxu1 }
 0x124   : > { %1052 = vst [vmem:[%s1694_s13 + $0x40] sm:$0xff] %v1020_v10  ;;  %1068 = vst [vmem:[%s1694_s13 + $0xc0] sm:$0xff] %v1036_v11  ;;  %v989_v16 = vadd.f32 %v1684_v46, %v950_v12  ;;  %v1005_v17 = vadd.f32 %v1684_v46, %v966_v13 }
 0x125   : > { %v748_v18 = vpop.f32.mrf.mxu0  ;;  %v812_v19 = vpop.f32.mrf.mxu1 }
 0x126   : > { %v1021_v20 = vmax.f32 %v989_v16, 0.0  ;;  %v1037_v21 = vmax.f32 %v1005_v17, 0.0  ;;  %v951_v22 = vmul.f32 %v1679_v44, %v748_v18  ;;  %v967_v23 = vmul.f32 %v1679_v44, %v812_v19 }
 0x127   : > { %v750_v24 = vpop.f32.mrf.mxu0  ;;  %v814_v25 = vpop.f32.mrf.mxu1 }
 0x128   : > { %1053 = vst [vmem:[%s1694_s13 + $0x48] sm:$0xff] %v1021_v20  ;;  %1069 = vst [vmem:[%s1694_s13 + $0xc8] sm:$0xff] %v1037_v21  ;;  %v990_v26 = vadd.f32 %v1684_v46, %v951_v22  ;;  %v1006_v27 = vadd.f32 %v1684_v46, %v967_v23 }
 0x129   : > { %v751_v28 = vpop.f32.mrf.mxu0  ;;  %v815_v29 = vpop.f32.mrf.mxu1 }
 0x12a   : > { %v1022_v30 = vmax.f32 %v990_v26, 0.0  ;;  %v1038_v31 = vmax.f32 %v1006_v27, 0.0  ;;  %v952_v32 = vmul.f32 %v1679_v44, %v751_v28  ;;  %v968_v33 = vmul.f32 %v1679_v44, %v815_v29 }
 0x12b   : > { %v753_v34 = vpop.f32.mrf.mxu0  ;;  %v817_v35 = vpop.f32.mrf.mxu1 }
 0x12c   : > { %1054 = vst [vmem:[%s1694_s13 + $0x50] sm:$0xff] %v1022_v30  ;;  %1070 = vst [vmem:[%s1694_s13 + $0xd0] sm:$0xff] %v1038_v31  ;;  %v991_v36 = vadd.f32 %v1684_v46, %v952_v32  ;;  %v1007_v37 = vadd.f32 %v1684_v46, %v968_v33 }
 0x12d   : > { %v756_v38 = vpop.f32.mrf.mxu0  ;;  %v820_v39 = vpop.f32.mrf.mxu1 }
 0x12e   : > { %v1023_v40 = vmax.f32 %v991_v36, 0.0  ;;  %v1039_v41 = vmax.f32 %v1007_v37, 0.0  ;;  %v953_v42 = vmul.f32 %v1679_v44, %v756_v38  ;;  %v969_v43 = vmul.f32 %v1679_v44, %v820_v39 }
 0x12f   : > { %v758_v45 = vpop.f32.mrf.mxu0  ;;  %v822_v47 = vpop.f32.mrf.mxu1 }
 0x130   : > { %1055 = vst [vmem:[%s1694_s13 + $0x58] sm:$0xff] %v1023_v40  ;;  %1071 = vst [vmem:[%s1694_s13 + $0xd8] sm:$0xff] %v1039_v41  ;;  %v992_v48 = vadd.f32 %v1684_v46, %v953_v42  ;;  %v1008_v49 = vadd.f32 %v1684_v46, %v969_v43 }
 0x131   : > { %v759_v50 = vpop.f32.mrf.mxu0  ;;  %v823_v51 = vpop.f32.mrf.mxu1 }
 0x132   : > { %v1024_v52 = vmax.f32 %v992_v48, 0.0  ;;  %v1040_v53 = vmax.f32 %v1008_v49, 0.0  ;;  %v954_v54 = vmul.f32 %v1679_v44, %v759_v50  ;;  %v970_v55 = vmul.f32 %v1679_v44, %v823_v51 }
 0x133   : > { %v761_v56 = vpop.f32.mrf.mxu0  ;;  %v825_v57 = vpop.f32.mrf.mxu1 }
 0x134   : > { %1056 = vst [vmem:[%s1694_s13 + $0x60] sm:$0xff] %v1024_v52  ;;  %1072 = vst [vmem:[%s1694_s13 + $0xe0] sm:$0xff] %v1040_v53  ;;  %v993_v58 = vadd.f32 %v1684_v46, %v954_v54  ;;  %v1009_v59 = vadd.f32 %v1684_v46, %v970_v55 }
 0x135   : > { %v764_v60 = vpop.f32.mrf.mxu0  ;;  %v828_v61 = vpop.f32.mrf.mxu1 }
 0x136   : > { %v1025_v62 = vmax.f32 %v993_v58, 0.0  ;;  %v1041_v63 = vmax.f32 %v1009_v59, 0.0  ;;  %v955_v0 = vmul.f32 %v1679_v44, %v764_v60  ;;  %v971_v1 = vmul.f32 %v1679_v44, %v828_v61 }
 0x137   : > { %v766_v2 = vpop.f32.mrf.mxu0  ;;  %v830_v3 = vpop.f32.mrf.mxu1 }
 0x138   : > { %1057 = vst [vmem:[%s1694_s13 + $0x68] sm:$0xff] %v1025_v62  ;;  %1073 = vst [vmem:[%s1694_s13 + $0xe8] sm:$0xff] %v1041_v63  ;;  %v994_v4 = vadd.f32 %v1684_v46, %v955_v0  ;;  %v1010_v5 = vadd.f32 %v1684_v46, %v971_v1 }
 0x139   : > { %v767_v6 = vpop.f32.mrf.mxu0  ;;  %v831_v7 = vpop.f32.mrf.mxu1 }
 0x13a   : > { %v1026_v8 = vmax.f32 %v994_v4, 0.0  ;;  %v1042_v9 = vmax.f32 %v1010_v5, 0.0  ;;  %v956_v10 = vmul.f32 %v1679_v44, %v767_v6  ;;  %v972_v11 = vmul.f32 %v1679_v44, %v831_v7 }
 0x13b   : > { %v769_v12 = vpop.f32.mrf.mxu0  ;;  %v833_v13 = vpop.f32.mrf.mxu1 }
 0x13c   : > { %1058 = vst [vmem:[%s1694_s13 + $0x70] sm:$0xff] %v1026_v8  ;;  %1074 = vst [vmem:[%s1694_s13 + $0xf0] sm:$0xff] %v1042_v9  ;;  %v995_v14 = vadd.f32 %v1684_v46, %v956_v10  ;;  %v1011_v15 = vadd.f32 %v1684_v46, %v972_v11 }
 0x13e   : > { %v1027_v44 = vmax.f32 %v995_v14, 0.0  ;;  %v1043_v16 = vmax.f32 %v1011_v15, 0.0 }
 0x140   : > { %1059 = vst [vmem:[%s1694_s13 + $0x78] sm:$0xff] %v1027_v44  ;;  %1075 = vst [vmem:[%s1694_s13 + $0xf8] sm:$0xff] %v1043_v16 }
 0x141   : > { %1442 = shalt.err (!%p1439_p5)
}
 0x142   : > { %s1443_s12 = scalar_lea.hbm %s1789_s7, 4096  ;;  %s1447_s22 = scalar_lea.hbm %s1846_s4, 8192 }
 0x143   : > { %p1444_p6 = scmp.ne.s32.totalorder %s1789_s7, %s1443_s12  ;;  %p1448_p10 = scmp.lt.s32.totalorder %s1789_s7, %s1846_s4 }
 0x144   : > { %p1449_p11 = scmp.lt.s32.totalorder %s1447_s22, %s1443_s12 }
 0x145   : > { %p1445_p7 = pnand %p1444_p6, %p1576_p4 }
 0x146   : > { %p1450_p12 = por %p1449_p11, %p1448_p10 }
 0x147   : > { %p1446_p9 = pneg %p1445_p7 }
 0x149   : > { %p1451_p13 = pnand %p1450_p12, %p1446_p9 }
 0x14b   : > { %1454 = shalt.err (!%p1451_p13)
}
 0x14c   : > { %s1509_s13 = smov 128   ;;  %s1510_s29 = smov 8  }
 0x14d   : > { %1313 = dma.vmem_to_hbm [thread:$0]  (%p1576_p4), %s1791_s30, 4096, %s1789_s7, %s1797_s18, %s1509_s13, %s1509_s13, %s1510_s29  }
 0x14e PF: > { %p1319_p0 = scmp.ge.s32.totalorder %s1505_s20, 2  ;;  %s1106_s5 = sand.u32 1, %s1485_s15  }
 0x14f   : > { %s1107_s6 = scalar_lea.sflag [#allocation4], %s1106_s5 }
 0x150   : > { %p1316_p1 = pnand %p1319_p0, %p1583_p8 }
 0x152   : > { %p1317_p2 = pneg %p1316_p1 }
 0x154   : > { %1480 = dma.done.wait (%p1317_p2), %s1107_s6, 4096  }
 0x155   : > { %1482 = vsyncadd (%p1317_p2), %s1107_s6, 4294963200  ;;  %s17_s20 = sadd.s32 1, %s1505_s20   ;;  %s1849_s15 = smov %s1489_s16 }
 0x156   : > { %p14_p3 = scmp.ge.s32.totalorder %s17_s20, 4   ;;  %s1850_s16 = smov %s1493_s17 }
 0x157   : > { %s1851_s17 = smov %s1589_s28  ;;  %s1852_s18 = smov %s1501_s19 }
 0x158   : > { %s1853_s19 = smov %s1855_s23  ;;  %16 = sbr.rel (!%p14_p3) target bundleno = 4 (0x4), region = 88 }
 0x15d   :  { %1112 = vsyncpa [#allocation4], 1 }
 0x15e   :  { %1114 = vsyncpa [#allocation4 + $0x1], 1 }

</bundles_post_ra>
